<compile_context>
chip_gen: v6e
topology: v6e:2x2x1
jax: 0.10.0
libtpu: 0.0.40
codegen_flags: <defaults>
</compile_context>

<pallas_src>
import functools

import jax
import jax.numpy as jnp
from jax.experimental import pallas as pl
from jax.experimental.pallas import tpu as pltpu


def _elu(x):
    # torch.nn.functional.elu (alpha=1). The min-clamp keeps the untaken branch
    # of the where finite (no inf/NaN poisoning under autodiff or debug checks).
    return jnp.where(x > 0, x, jnp.exp(jnp.minimum(x, 0.0)) - 1.0)


def _round_up(x, m):
    return (x + m - 1) // m * m


# ----------------------------------------------------------------------------
# Parameter init (PyTorch-equivalent layout, weights stored as [in, out]) and
# one-time packing into the fused/padded layout the kernel consumes.
# ----------------------------------------------------------------------------
def init_params(key, dim_in, dim_out, n_components):
    hidden = dim_in  # hidden_dim defaults to in_dim in the PyTorch module
    K, D = n_components, dim_out
    keys = jax.random.split(key, 8)
    scale = 0.1

    def w(k, shape):
        return (scale * jax.random.normal(k, shape)).astype(jnp.float32)

    pw1 = w(keys[0], (dim_in, hidden))
    pb1 = w(keys[1], (1, hidden))
    pw2 = w(keys[2], (hidden, K))
    pb2 = w(keys[3], (1, K))
    nw1 = w(keys[4], (dim_in, hidden))
    nb1 = w(keys[5], (1, hidden))
    nw2 = w(keys[6], (hidden, 2 * D * K))
    nb2 = w(keys[7], (1, 2 * D * K))
    return (pw1, pb1, pw2, pb2, nw1, nb1, nw2, nb2)


def pack_params(params, *, dim_out, n_components, dtype=jnp.bfloat16):
    """Fuse the two branches into one MLP (done once, outside the kernel).

      W1 = [pw1 | nw1]            (dim_in, 2*hidden)  -> padded to h_pad (mult. of 8)
      W2 = blockdiag(pw2, nw2)    (2*hidden, K + 2*K*D)

    Weights are stored in `dtype` (bf16 by default) for MXU; biases stay f32.
    """
    (pw1, pb1, pw2, pb2, nw1, nb1, nw2, nb2) = params
    dim_in, H = pw1.shape
    K, D = n_components, dim_out
    out_total = K + 2 * K * D

    h_pad = _round_up(2 * H, 8)

    w1 = jnp.zeros((dim_in, h_pad), jnp.float32)
    w1 = w1.at[:, :H].set(pw1).at[:, H:2 * H].set(nw1)
    b1 = jnp.zeros((1, h_pad), jnp.float32)
    b1 = b1.at[:, :H].set(pb1).at[:, H:2 * H].set(nb1)

    w2 = jnp.zeros((h_pad, out_total), jnp.float32)
    w2 = w2.at[:H, :K].set(pw2).at[H:2 * H, K:out_total].set(nw2)
    b2 = jnp.zeros((1, out_total), jnp.float32)
    b2 = b2.at[:, :K].set(pb2).at[:, K:out_total].set(nb2)
    return (w1.astype(dtype), b1, w2.astype(dtype), b2)


# ----------------------------------------------------------------------------
# Fused kernel: x @ W1 + b1 -> ELU -> (@ W2 + b2) -> masked (ELU(sd)+1+1e-7)
# ----------------------------------------------------------------------------
def _mdn_kernel(x_ref, w1_ref, b1_ref, w2_ref, b2_ref, out_ref, *, sd_start):
    # First fused matmul (pi branch | normal branch concatenated along lanes).
    h = jnp.dot(x_ref[...], w1_ref[...], preferred_element_type=jnp.float32)
    h = _elu(h + b1_ref[...])

    # Second fused (block-diagonal) matmul producing [pi | mean | sd] columns.
    p = jnp.dot(h.astype(w2_ref.dtype), w2_ref[...],
                preferred_element_type=jnp.float32)
    p = p + b2_ref[...]

    # ELU(sd) + 1 + 1e-7 on the trailing sd columns only. The mask is a single
    # (1, out_w) iota row that the where broadcasts — no full-tile iota per step.
    col = jax.lax.broadcasted_iota(jnp.int32, (1, p.shape[1]), 1)
    out_ref[...] = jnp.where(col >= sd_start, _elu(p) + 1.0 + 1e-7, p)


def _default_tile_n(N, max_tile=4096):
    if N <= 16:
        return N
    # >= 2 grid steps so the "parallel" batch axis can shard across TensorCores
    # on megacore parts (v7x); cap at 4096 rows so the double-buffered VMEM
    # footprint stays well inside every generation's (raised) scoped limit.
    half = _round_up(pl.cdiv(N, 2), 16)
    return min(max_tile, half, N)


def mdn_forward_packed(x, packed_params, *, dim_out, n_components, tile_n=None):
    """Runs the fused kernel; returns the packed [N, K + 2*K*D] f32 slab
    laid out as (pi_logits | mean | sd)."""
    w1, b1, w2, b2 = packed_params
    N, dim_in = x.shape
    K, D = n_components, dim_out
    out_w = K + 2 * K * D
    h_pad = w1.shape[1]
    assert w2.shape == (h_pad, out_w)

    if tile_n is None:
        tile_n = _default_tile_n(N)
    grid = (pl.cdiv(N, tile_n),)
    sd_start = K + K * D

    x = x.astype(w1.dtype)  # bf16 MXU operand by default (weights set the dtype)

    weight_bytes = sum(int(a.size) * a.dtype.itemsize for a in (w1, b1, w2, b2))
    cost = pl.CostEstimate(
        flops=2 * N * (dim_in * h_pad + h_pad * out_w),
        transcendentals=N * (h_pad + out_w),
        bytes_accessed=int(x.size) * x.dtype.itemsize + weight_bytes + N * out_w * 4,
    )

    kernel = functools.partial(_mdn_kernel, sd_start=sd_start)

    packed_out = pl.pallas_call(
        kernel,
        grid=grid,
        in_specs=[
            pl.BlockSpec((tile_n, dim_in), lambda i: (i, 0)),  # x: streamed over batch
            pl.BlockSpec((dim_in, h_pad), lambda i: (0, 0)),   # fused W1 (VMEM-resident)
            pl.BlockSpec((1, h_pad), lambda i: (0, 0)),        # fused b1 (resident)
            pl.BlockSpec((h_pad, out_w), lambda i: (0, 0)),    # fused W2 (resident)
            pl.BlockSpec((1, out_w), lambda i: (0, 0)),        # fused b2 (resident)
        ],
        out_specs=pl.BlockSpec((tile_n, out_w), lambda i: (i, 0)),
        out_shape=jax.ShapeDtypeStruct((N, out_w), jnp.float32),
        compiler_params=pltpu.CompilerParams(
            dimension_semantics=("parallel",),
            vmem_limit_bytes=32 * 1024 * 1024,
        ),
        cost_estimate=cost,
    )(x, w1, b1, w2, b2)
    return packed_out


def mdn_forward(x, packed_params, *, dim_out, n_components, tile_n=None):
    """Returns (pi_logits [N,K], mean [N,K,D], sd [N,K,D]).

    NOTE: call this inside the same jit as the downstream loss/sampler so the
    slices below fuse with the consumer instead of adding an extra HBM pass;
    or use mdn_forward_packed and slice at the point of use.
    """
    K, D = n_components, dim_out
    N = x.shape[0]
    packed = mdn_forward_packed(
        x, packed_params, dim_out=dim_out, n_components=n_components, tile_n=tile_n)
    pi_logits = packed[:, :K]
    mean = packed[:, K:K + K * D].reshape(N, K, D)
    sd = packed[:, K + K * D:].reshape(N, K, D)
    # TODO(synk): distribution-object construction (OneHotCategorical/Normal) has
    # no Pallas equivalent; (pi_logits, mean, sd) fully parameterize them.
    return pi_logits, mean, sd


# ----------------------------------------------------------------------------
# Pure-JAX reference mirroring the PyTorch forward (unfused f32 weights).
# ----------------------------------------------------------------------------
def mdn_reference(x, params, *, dim_out, n_components):
    (pw1, pb1, pw2, pb2, nw1, nb1, nw2, nb2) = params
    K, D = n_components, dim_out
    N = x.shape[0]

    h = _elu(x @ pw1 + pb1)
    pi_logits = h @ pw2 + pb2

    g = _elu(x @ nw1 + nb1)
    p = g @ nw2 + nb2
    half = p.shape[1] // 2
    mean = p[:, :half].reshape(N, K, D)
    sd = (_elu(p[:, half:]) + 1.0 + 1e-7).reshape(N, K, D)
    return pi_logits, mean, sd


if __name__ == "__main__":
    dim_in, dim_out, n_components = 32, 4, 3

    key = jax.random.PRNGKey(0)
    kx, kp, kx2 = jax.random.split(key, 3)
    params = init_params(kp, dim_in, dim_out, n_components)

    fwd = jax.jit(functools.partial(
        mdn_forward, dim_out=dim_out, n_components=n_components))

    # Test 1: f32 weight packing, small batch (single grid step) — exact check.
    packed_f32 = pack_params(params, dim_out=dim_out, n_components=n_components,
                             dtype=jnp.float32)
    batch = 8
    x = jax.random.normal(kx, (batch, dim_in), dtype=jnp.float32)
    pi, mean, sd = jax.block_until_ready(fwd(x, packed_f32))
    pi_ref, mean_ref, sd_ref = mdn_reference(
        x, params, dim_out=dim_out, n_components=n_components)
    assert pi.shape == (batch, n_components)
    assert mean.shape == (batch, n_components, dim_out)
    assert sd.shape == (batch, n_components, dim_out)
    assert jnp.allclose(pi, pi_ref, atol=1e-5)
    assert jnp.allclose(mean, mean_ref, atol=1e-5)
    assert jnp.allclose(sd, sd_ref, atol=1e-5)

    # Test 2: default bf16 MXU packing, larger batch -> 2 grid steps (pipelined,
    # megacore-shardable). bf16 is a deliberate precision trade-off: loose tol.
    packed_bf16 = pack_params(params, dim_out=dim_out, n_components=n_components)
    batch2 = 64
    x2 = jax.random.normal(kx2, (batch2, dim_in), dtype=jnp.float32)
    pi2, mean2, sd2 = jax.block_until_ready(fwd(x2, packed_bf16))
    pi2_ref, mean2_ref, sd2_ref = mdn_reference(
        x2, params, dim_out=dim_out, n_components=n_components)
    assert jnp.allclose(pi2, pi2_ref, atol=5e-2, rtol=5e-2)
    assert jnp.allclose(mean2, mean2_ref, atol=5e-2, rtol=5e-2)
    assert jnp.allclose(sd2, sd2_ref, atol=5e-2, rtol=5e-2)

    print("KERNEL_OK")
</pallas_src>

<mosaic_0001>
module attributes {stable_mosaic.version = 11 : i64} {
  func.func @_mdn_kernel(%arg0: i32, %arg1: memref<8x32xf32, #tpu.memory_space<vmem>>, %arg2: memref<32x64xf32, #tpu.memory_space<vmem>>, %arg3: memref<1x64xf32, #tpu.memory_space<vmem>>, %arg4: memref<64x27xf32, #tpu.memory_space<vmem>>, %arg5: memref<1x27xf32, #tpu.memory_space<vmem>>, %arg6: memref<8x27xf32, #tpu.memory_space<vmem>>) attributes {dimension_semantics = [#tpu.dimension_semantics<parallel>], iteration_bounds = array<i64: 1>, scalar_prefetch = 0 : i64, scratch_operands = 0 : i64, tpu.core_type = #tpu.core_type<tc>, window_params = [{transform_indices = @transform_0, window_bounds = array<i64: 8, 32>}, {pipeline_mode = #tpu.pipeline_mode<synchronous>, transform_indices = @transform_1, window_bounds = array<i64: 32, 64>}, {pipeline_mode = #tpu.pipeline_mode<synchronous>, transform_indices = @transform_2, window_bounds = array<i64: 1, 64>}, {pipeline_mode = #tpu.pipeline_mode<synchronous>, transform_indices = @transform_3, window_bounds = array<i64: 64, 27>}, {pipeline_mode = #tpu.pipeline_mode<synchronous>, transform_indices = @transform_4, window_bounds = array<i64: 1, 27>}, {transform_indices = @transform_5, window_bounds = array<i64: 8, 27>}]} {
    %c0 = arith.constant 0 : index
    %c0_0 = arith.constant 0 : index
    %0 = vector.load %arg1[%c0, %c0_0] : memref<8x32xf32, #tpu.memory_space<vmem>>, vector<8x32xf32>
    %c0_1 = arith.constant 0 : index
    %c0_2 = arith.constant 0 : index
    %1 = vector.load %arg2[%c0_1, %c0_2] : memref<32x64xf32, #tpu.memory_space<vmem>>, vector<32x64xf32>
    %cst = arith.constant dense<0.000000e+00> : vector<8x64xf32>
    %2 = tpu.matmul %0, %1, %cst {dimension_numbers = #tpu.dot_dimension_numbers<[1], [0], [0], [1], [0, 0, 1, 1], [], []>} : vector<8x32xf32>, vector<32x64xf32>, vector<8x64xf32> -> vector<8x64xf32>
    %c0_3 = arith.constant 0 : index
    %c0_4 = arith.constant 0 : index
    %3 = vector.load %arg3[%c0_3, %c0_4] : memref<1x64xf32, #tpu.memory_space<vmem>>, vector<1x64xf32>
    %4 = vector.broadcast %3 : vector<1x64xf32> to vector<8x64xf32>
    %5 = arith.addf %2, %4 : vector<8x64xf32>
    %cst_5 = arith.constant 0.000000e+00 : f32
    %6 = vector.broadcast %cst_5 : f32 to vector<8x64xf32>
    %7 = arith.cmpf ogt, %5, %6 : vector<8x64xf32>
    %cst_6 = arith.constant 0.000000e+00 : f32
    %8 = vector.broadcast %cst_6 : f32 to vector<8x64xf32>
    %9 = arith.minimumf %5, %8 : vector<8x64xf32>
    %10 = math.exp %9 : vector<8x64xf32>
    %cst_7 = arith.constant 1.000000e+00 : f32
    %11 = vector.broadcast %cst_7 : f32 to vector<8x64xf32>
    %12 = arith.subf %10, %11 : vector<8x64xf32>
    %13 = arith.select %7, %5, %12 : vector<8x64xi1>, vector<8x64xf32>
    %c0_8 = arith.constant 0 : index
    %c0_9 = arith.constant 0 : index
    %14 = vector.load %arg4[%c0_8, %c0_9] : memref<64x27xf32, #tpu.memory_space<vmem>>, vector<64x27xf32>
    %cst_10 = arith.constant dense<0.000000e+00> : vector<8x27xf32>
    %15 = tpu.matmul %13, %14, %cst_10 {dimension_numbers = #tpu.dot_dimension_numbers<[1], [0], [0], [1], [0, 0, 1, 1], [], []>} : vector<8x64xf32>, vector<64x27xf32>, vector<8x27xf32> -> vector<8x27xf32>
    %c0_11 = arith.constant 0 : index
    %c0_12 = arith.constant 0 : index
    %16 = vector.load %arg5[%c0_11, %c0_12] : memref<1x27xf32, #tpu.memory_space<vmem>>, vector<1x27xf32>
    %17 = vector.broadcast %16 : vector<1x27xf32> to vector<8x27xf32>
    %18 = arith.addf %15, %17 : vector<8x27xf32>
    %19 = tpu.iota {dimensions = array<i32: 1>} : vector<1x27xi32>
    %c15_i32 = arith.constant 15 : i32
    %20 = vector.broadcast %c15_i32 : i32 to vector<1x27xi32>
    %21 = arith.cmpi sge, %19, %20 : vector<1x27xi32>
    %cst_13 = arith.constant 0.000000e+00 : f32
    %22 = vector.broadcast %cst_13 : f32 to vector<8x27xf32>
    %23 = arith.cmpf ogt, %18, %22 : vector<8x27xf32>
    %cst_14 = arith.constant 0.000000e+00 : f32
    %24 = vector.broadcast %cst_14 : f32 to vector<8x27xf32>
    %25 = arith.minimumf %18, %24 : vector<8x27xf32>
    %26 = math.exp %25 : vector<8x27xf32>
    %cst_15 = arith.constant 1.000000e+00 : f32
    %27 = vector.broadcast %cst_15 : f32 to vector<8x27xf32>
    %28 = arith.subf %26, %27 : vector<8x27xf32>
    %29 = arith.select %23, %18, %28 : vector<8x27xi1>, vector<8x27xf32>
    %cst_16 = arith.constant 1.000000e+00 : f32
    %30 = vector.broadcast %cst_16 : f32 to vector<8x27xf32>
    %31 = arith.addf %29, %30 : vector<8x27xf32>
    %cst_17 = arith.constant 1.000000e-07 : f32
    %32 = vector.broadcast %cst_17 : f32 to vector<8x27xf32>
    %33 = arith.addf %31, %32 : vector<8x27xf32>
    %34 = vector.shape_cast %21 : vector<1x27xi1> to vector<1x27xi1>
    %35 = vector.broadcast %34 : vector<1x27xi1> to vector<8x27xi1>
    %36 = arith.select %35, %33, %18 : vector<8x27xi1>, vector<8x27xf32>
    %c0_18 = arith.constant 0 : index
    %c0_19 = arith.constant 0 : index
    %37 = vector.load %arg6[%c0_18, %c0_19] : memref<8x27xf32, #tpu.memory_space<vmem>>, vector<8x27xf32>
    tpu.vector_store %arg6[%c0_18, %c0_19], %36 {strides = array<i32>} : memref<8x27xf32, #tpu.memory_space<vmem>>, vector<8x27xf32>,
    return
  }
  func.func @transform_0(%arg0: i32) -> (i32, i32) {
    %c0_i32 = arith.constant 0 : i32
    %c0_i32_0 = arith.constant 0 : i32
    return %arg0, %c0_i32 : i32, i32
  }
  func.func @transform_1(%arg0: i32) -> (i32, i32) {
    %c0_i32 = arith.constant 0 : i32
    %c0_i32_0 = arith.constant 0 : i32
    %c0_i32_1 = arith.constant 0 : i32
    return %c0_i32, %c0_i32_0 : i32, i32
  }
  func.func @transform_2(%arg0: i32) -> (i32, i32) {
    %c0_i32 = arith.constant 0 : i32
    %c0_i32_0 = arith.constant 0 : i32
    %c0_i32_1 = arith.constant 0 : i32
    return %c0_i32, %c0_i32_0 : i32, i32
  }
  func.func @transform_3(%arg0: i32) -> (i32, i32) {
    %c0_i32 = arith.constant 0 : i32
    %c0_i32_0 = arith.constant 0 : i32
    %c0_i32_1 = arith.constant 0 : i32
    return %c0_i32, %c0_i32_0 : i32, i32
  }
  func.func @transform_4(%arg0: i32) -> (i32, i32) {
    %c0_i32 = arith.constant 0 : i32
    %c0_i32_0 = arith.constant 0 : i32
    %c0_i32_1 = arith.constant 0 : i32
    return %c0_i32, %c0_i32_0 : i32, i32
  }
  func.func @transform_5(%arg0: i32) -> (i32, i32) {
    %c0_i32 = arith.constant 0 : i32
    %c0_i32_0 = arith.constant 0 : i32
    return %arg0, %c0_i32 : i32, i32
  }
}

</mosaic_0001>

<bundles_post_ra>
// kernel: mdn_forward.1
= control target key start
LH: loop header
LB: loop body
LE: loop exit
PB: predicated region body
PF: predicated region fallthrough
CT: control target
= control target key end

     0   :  { %v277_v0 = vmov 0.0   ;;  %vm278_vm0 = vmmov 0   ;;  %vm32_vm1 = vcmask 261120   ;;  %vm127_vm2 = vcmask 523264   ;;  %s357_s1 = inlined_call_operand.vmem [shape: f32[32,64], index: 1, kind: input, shape index: {}]   ;;  %s358_s0 = inlined_call_operand.vmem [shape: f32[8,32], index: 0, kind: input, shape index: {}]   ;;  %s359_s3 = inlined_call_operand.vmem [shape: f32[64,27], index: 3, kind: input, shape index: {}]   ;;  %s360_s2 = inlined_call_operand.vmem [shape: f32[1,64], index: 2, kind: input, shape index: {}]   ;;  %s361_s4 = inlined_call_operand.vmem [shape: f32[1,27], index: 4, kind: input, shape index: {}]   ;;  %s362_s5 = inlined_call_operand.vmem [shape: f32[8,27], index: 5, kind: output, shape index: {}]  }
   0x1   :  { %241 = vmatprep.subr.mxu0 %v277_v0  ;;  %v24_v1 = vld [vmem:[%s357_s1 + $0x18] sm:$0xff]  ;;  %v23_v2 = vld [vmem:[%s357_s1 + $0x10] sm:$0xff]  ;;  %249 = vmatprep.mubr.msk.f32.mxu0 %vm278_vm0, %v277_v0  ;;  %v22_v3 = vld [vmem:[%s357_s1 + $0x8] sm:$0xff]  ;;  %v201_v29 = vlaneseq  ;;  %vm215_vm6 = vcmask 220160  }
   0x2   :  { %242 = vmatpush3.msra.mxu0 %v24_v1  ;;  %252 = vmatprep.subr.mxu1 %v277_v0  ;;  %v21_v4 = vld [vmem:[%s357_s1] sm:$0xff]  ;;  %v119_v6 = vld [vmem:[%s359_s3 + $0x38] sm:$0xff]  ;;  %v118_v7 = vld [vmem:[%s359_s3 + $0x30] sm:$0xff] }
   0x3   :  { %243 = vmatprep.subr.mxu0 %v277_v0  ;;  %268 = vmatprep.mubr.msk.f32.mxu1 %vm278_vm0, %v277_v0  ;;  %v20_v5 = vld [vmem:[%s358_s0] sm:$0xff]  ;;  %v117_v8 = vld [vmem:[%s359_s3 + $0x28] sm:$0xff]  ;;  %v115_v10 = vld [vmem:[%s359_s3 + $0x18] sm:$0xff]  ;;  %v202_v31 = vand.u32 127, %v201_v29 }
   0x4   :  { %244 = vmatpush3.msra.mxu0 %v23_v2  ;;  %253 = vmatpush3.msra.mxu1 %v119_v6  ;;  %v116_v9 = vld [vmem:[%s359_s3 + $0x20] sm:$0xff]  ;;  %v114_v11 = vld [vmem:[%s359_s3 + $0x10] sm:$0xff]  ;;  %v113_v12 = vld [vmem:[%s359_s3 + $0x8] sm:$0xff] }
   0x5   :  { %245 = vmatprep.subr.mxu0 %v277_v0  ;;  %254 = vmatprep.subr.mxu1 %v277_v0  ;;  %v112_v13 = vld [vmem:[%s359_s3] sm:$0xff]  ;;  %vm203_vm5 = vcmp.ge.s32.totalorder %v202_v31, 15 }
   0x6   :  { %246 = vmatpush3.msra.mxu0 %v22_v3  ;;  %255 = vmatpush3.msra.mxu1 %v118_v7  ;;  %v221_v14 = vld [vmem:[%s360_s2] ss:$0 sm:$0xff] }
   0x7   :  { %247 = vmatprep.subr.mxu0 %v277_v0  ;;  %256 = vmatprep.subr.mxu1 %v277_v0  ;;  %v224_v23 = vld [vmem:[%s361_s4] ss:$0 sm:$0xff] }
   0x8   :  { %248 = vmatpush3.msra.mxu0 %v21_v4  ;;  %257 = vmatpush3.msra.mxu1 %v117_v8 }
   0x9   :  { %250 = vmatmul.mubr.msk.f32.vlgmr.msra.gmra.mxu0 %vm32_vm1, %v20_v5  ;;  %258 = vmatprep.subr.mxu1 %v277_v0 }
   0xa   :  { %259 = vmatpush3.msra.mxu1 %v116_v9 }
   0xb   :  { %260 = vmatprep.subr.mxu1 %v277_v0 }
   0xc   :  { %261 = vmatpush3.msra.mxu1 %v115_v10 }
   0xd   :  { %262 = vmatprep.subr.mxu1 %v277_v0 }
   0xe   :  { %263 = vmatpush3.msra.mxu1 %v114_v11 }
   0xf   :  { %264 = vmatprep.subr.mxu1 %v277_v0 }
  0x10   :  { %265 = vmatpush3.msra.mxu1 %v113_v12 }
  0x11   :  { %266 = vmatprep.subr.mxu1 %v277_v0 }
  0x12   :  { %267 = vmatpush3.msra.mxu1 %v112_v13 }
  0xc9   :  { %v102_v15 = vpop.f32.mrf.mxu0 }
  0xca   :  { %v103_v16 = vadd.f32 %v221_v14, %v102_v15 }
  0xcb   :  { %v251_v17 = vpop.f32.mrf.mxu0 }
  0xcc   :  { %v107_v18 = vmin.f32 %v103_v16, 0.0  ;;  %vm106_vm3 = vcmp.gt.f32.partialorder %v103_v16, 0.0 }
  0xce   :  { %v108_v19 = vmul.f32 1.442695, %v107_v18 }
  0xd0   :  { %273 = vpow2.f32 %v108_v19 }
  0xdd   :  { %v274_v20 = vpop.eup %273 }
  0xde   :  { %v223_v21 = vadd.f32 -1.0, %v274_v20 }
  0xe0   :  { %v111_v22 = vsel %vm106_vm3, %v103_v16, %v223_v21 }
  0xe1   :  { %269 = vmatmul.mubr.msk.f32.vlgmr.msra.gmra.mxu1 %vm127_vm2, %v111_v22 }
 0x1a1   :  { %v197_v24 = vpop.f32.mrf.mxu1 }
 0x1a2   :  { %v198_v25 = vadd.f32 %v224_v23, %v197_v24 }
 0x1a3   :  { %v270_v26 = vpop.f32.mrf.mxu1 }
 0x1a4   :  { %v205_v27 = vmin.f32 %v198_v25, 0.0  ;;  %vm204_vm4 = vcmp.gt.f32.partialorder %v198_v25, 0.0 }
 0x1a6   :  { %v206_v28 = vmul.f32 1.442695, %v205_v27 }
 0x1a8   :  { %275 = vpow2.f32 %v206_v28 }
 0x1b5   :  { %v276_v30 = vpop.eup %275 }
 0x1b6   :  { %v226_v32 = vadd.f32 -1.0, %v276_v30 }
 0x1b8   :  { %v209_v33 = vsel %vm204_vm4, %v198_v25, %v226_v32 }
 0x1b9   :  { %v210_v34 = vadd.f32 1.0, %v209_v33 }
 0x1bb   :  { %v211_v35 = vadd.f32 1e-07, %v210_v34 }
 0x1bd   :  { %v214_v36 = vsel %vm203_vm5, %v211_v35, %v198_v25 }
 0x1be   :  { %216 = vst.msk [vmem:[%s362_s5] sm:$0xff] %vm215_vm6, %v214_v36 }

</bundles_post_ra>
